<compile_context>
chip_gen: v7x
topology: tpu7x:2x2x1
jax: 0.10.0
libtpu: 0.0.40
codegen_flags: <defaults>
</compile_context>

<pallas_src>
import jax
import jax.numpy as jnp
import numpy as np
from jax.experimental import pallas as pl
from jax.experimental.pallas import tpu as pltpu


_ROW_ALIGN = 16    # bf16 packs 16 rows per vreg (sublane pairs)
_LANE = 128        # TPU lane width


def _cdiv(a, b):
    return -(-a // b)


def _round_up(n, m):
    return _cdiv(n, m) * m


def _silu(v):
    # sigmoid = 1 / (1 + exp(-v)); exp and the approximate reciprocal both run
    # on the EUP slot, keeping VALU slots free for the bias add / multiply.
    return v * pl.reciprocal(1.0 + jnp.exp(-v), approx=True)


def _durator_mlp_kernel(x_ref, w1t_ref, b1_ref, w2t_ref, b2_ref, o_ref):
    """One grid step = one tile of rows.

    x_ref   : (TM, H)      input dtype (cast to bf16 in-kernel)
    w1t_ref : (H, H)       bf16  (= W1.T, prepared once off the hot path)
    b1_ref  : (1, H)       f32
    w2t_ref : (H, O_pad)   bf16  (= W2.T zero-padded to a 128-lane multiple)
    b2_ref  : (1, O_pad)   f32   (zero-padded)
    o_ref   : (TM, O_pad)  bf16 by default — single lane-dense store
    """
    x = x_ref[...].astype(jnp.bfloat16)        # in-kernel cast: no extra HBM pass over x

    # Linear 1 (MXU, bf16 in / f32 acc) + bias + SiLU.
    h = jnp.dot(x, w1t_ref[...], preferred_element_type=jnp.float32)
    h = _silu(h + b1_ref[...])

    # Linear 2 + bias + SiLU.  The zero-padded output columns stay exactly
    # SiLU(0 + 0) = 0 and are sliced off in the wrapper.
    y = jnp.dot(h.astype(jnp.bfloat16), w2t_ref[...],
                preferred_element_type=jnp.float32)
    y = _silu(y + b2_ref[...])

    o_ref[...] = y.astype(o_ref.dtype)         # unmasked 128-lane-wide store


def prepare_durator_mlp_params(w1, b1, w2, b2):
    """One-time weight preparation (cache the result across calls):
    transpose to (in, out), cast to bf16, and zero-pad the output dimension up
    to a 128-lane multiple so the kernel's output store is lane-dense."""
    w1 = jnp.asarray(w1)
    w2 = jnp.asarray(w2)
    hidden_dim = w1.shape[1]
    output_dim = w2.shape[0]
    o_pad = _round_up(output_dim, _LANE)

    w1t = w1.T.astype(jnp.bfloat16)                                   # (H, H)
    w2t = jnp.zeros((hidden_dim, o_pad), jnp.bfloat16)
    w2t = w2t.at[:, :output_dim].set(w2.T.astype(jnp.bfloat16))       # (H, O_pad)
    b1r = jnp.asarray(b1, jnp.float32).reshape(1, hidden_dim)
    b2r = jnp.zeros((1, o_pad), jnp.float32)
    b2r = b2r.at[0, :output_dim].set(jnp.asarray(b2, jnp.float32))

    return dict(w1t=w1t, b1=b1r, w2t=w2t, b2=b2r,
                hidden_dim=hidden_dim, output_dim=output_dim,
                padded_output_dim=o_pad)


def _pick_row_tile(n_rows, block_rows):
    """Balanced row tile: a multiple of 16 (bf16 sublane packing), at most
    block_rows, at least 2 grid steps when there is enough work (so both v7x
    TensorCores participate), and worst-case padding < one tile."""
    n_steps = max(1, _cdiv(n_rows, block_rows))
    if n_steps == 1 and n_rows >= 2 * _ROW_ALIGN:
        n_steps = 2
    return _round_up(_cdiv(n_rows, n_steps), _ROW_ALIGN)


def _vmem_limit_bytes(tm, hidden_dim, o_pad):
    x_tile = tm * hidden_dim * 4                 # f32 input tile
    out_tile = tm * o_pad * 2                    # bf16 output tile
    weights = (hidden_dim * hidden_dim + hidden_dim * o_pad) * 2   # bf16
    biases = (hidden_dim + o_pad) * 4
    live = tm * (hidden_dim + o_pad) * 4         # f32 h / y intermediates
    est = 2 * (x_tile + out_tile) + 2 * (weights + biases) + live
    return int(min(max(2 * est, 16 << 20), 48 << 20))


def durator_mlp_apply(params, x, *, block_rows=512, out_dtype=jnp.bfloat16):
    """Hot path: no weight casts/transposes, no cast of x — only a (possible)
    ragged-tail pad of x and the pallas_call itself."""
    hidden_dim = params["hidden_dim"]
    output_dim = params["output_dim"]
    o_pad = params["padded_output_dim"]
    assert x.shape[-1] == hidden_dim

    lead = x.shape[:-1]
    xf = x.reshape(-1, hidden_dim)               # contiguous view, no copy
    n_rows = xf.shape[0]

    tm = _pick_row_tile(n_rows, block_rows)
    grid_n = _cdiv(n_rows, tm)
    n_pad = grid_n * tm
    if n_pad != n_rows:                          # ragged tail only; pad < one tile
        xf = jnp.pad(xf, ((0, n_pad - n_rows), (0, 0)))

    vmem_limit = _vmem_limit_bytes(tm, hidden_dim, o_pad)
    # TODO(synk): for very large hidden_dim, switch the resident-weight scheme
    # to a K-tiled grid axis with an f32 accumulator (v7x has only 64 MiB VMEM),
    # and for very large N fold rows into lanes instead of padding O to 128.

    def in_specs(single_buffer_weights):
        # Constant-index weight/bias blocks: single-buffer them (their
        # index_map is always (0,0)), keep default double-buffering for x/out.
        w_kw = dict(pipeline_mode=pl.Buffered(1)) if single_buffer_weights else {}
        return [
            pl.BlockSpec((tm, hidden_dim), lambda i: (i, 0)),                 # x tile
            pl.BlockSpec((hidden_dim, hidden_dim), lambda i: (0, 0), **w_kw),  # W1.T
            pl.BlockSpec((1, hidden_dim), lambda i: (0, 0), **w_kw),           # b1
            pl.BlockSpec((hidden_dim, o_pad), lambda i: (0, 0), **w_kw),       # W2.T
            pl.BlockSpec((1, o_pad), lambda i: (0, 0), **w_kw),                # b2
        ]

    def run(single_buffer_weights):
        return pl.pallas_call(
            _durator_mlp_kernel,
            out_shape=jax.ShapeDtypeStruct((n_pad, o_pad), out_dtype),
            grid_spec=pltpu.PrefetchScalarGridSpec(
                num_scalar_prefetch=0,
                grid=(grid_n,),
                in_specs=in_specs(single_buffer_weights),
                out_specs=pl.BlockSpec((tm, o_pad), lambda i: (i, 0)),
            ),
            compiler_params=pltpu.CompilerParams(
                dimension_semantics=("parallel",),
                vmem_limit_bytes=vmem_limit),
        )(xf, params["w1t"], params["b1"], params["w2t"], params["b2"])

    try:
        out = run(True)        # single-buffered constant weights (halved VMEM)
    except Exception:          # fallback if this JAX build rejects Buffered(1)
        out = run(False)

    out = out[:n_rows, :output_dim]
    return out.reshape(*lead, output_dim)


def durator_mlp(x, w1, b1, w2, b2, **kwargs):
    """One-shot convenience wrapper.  For repeated calls, build the params once
    with prepare_durator_mlp_params() and call durator_mlp_apply()."""
    return durator_mlp_apply(prepare_durator_mlp_params(w1, b1, w2, b2), x, **kwargs)


def reference_durator_mlp(x, w1, b1, w2, b2):
    """Pure-JAX reference mirroring the PyTorch forward with the same
    bf16-matmul / f32-accumulate numerics as the kernel (exact sigmoid)."""
    h = jnp.dot(x.astype(jnp.bfloat16), w1.T.astype(jnp.bfloat16),
                preferred_element_type=jnp.float32) + b1
    h = h * jax.nn.sigmoid(h)
    y = jnp.dot(h.astype(jnp.bfloat16), w2.T.astype(jnp.bfloat16),
                preferred_element_type=jnp.float32) + b2
    y = y * jax.nn.sigmoid(y)
    return y


if __name__ == "__main__":
    # Small shapes consistent with the module: (batch, seq, hidden) tokens.
    B, T, hidden_dim, output_dim = 2, 8, 32, 16

    key = jax.random.PRNGKey(0)
    kx, kw1, kb1, kw2, kb2, kx2 = jax.random.split(key, 6)

    x = jax.random.normal(kx, (B, T, hidden_dim), dtype=jnp.float32)

    # nn.Linear convention: weight (out_features, in_features), bias (out_features,)
    w1 = jax.random.normal(kw1, (hidden_dim, hidden_dim), dtype=jnp.float32) * 0.1
    b1 = jax.random.normal(kb1, (hidden_dim,), dtype=jnp.float32) * 0.1
    w2 = jax.random.normal(kw2, (output_dim, hidden_dim), dtype=jnp.float32) * 0.1
    b2 = jax.random.normal(kb2, (output_dim,), dtype=jnp.float32) * 0.1

    # One-time weight preparation, off the hot path (cache this in practice).
    params = prepare_durator_mlp_params(w1, b1, w2, b2)

    # Case 1: tiny N -> single grid step.
    y = jax.block_until_ready(durator_mlp_apply(params, x))
    y_ref = reference_durator_mlp(x, w1, b1, w2, b2)
    assert y.shape == (B, T, output_dim)
    np.testing.assert_allclose(np.asarray(y.astype(jnp.float32)),
                               np.asarray(y_ref), rtol=2e-2, atol=2e-2)

    # Case 2: multi-step grid with a ragged (padded) last tile.
    x2 = jax.random.normal(kx2, (3, 40, hidden_dim), dtype=jnp.float32)
    y2 = jax.block_until_ready(durator_mlp_apply(params, x2))
    y2_ref = reference_durator_mlp(x2, w1, b1, w2, b2)
    assert y2.shape == (3, 40, output_dim)
    np.testing.assert_allclose(np.asarray(y2.astype(jnp.float32)),
                               np.asarray(y2_ref), rtol=2e-2, atol=2e-2)

    print("KERNEL_OK")
</pallas_src>

<mosaic_0001>
module attributes {stable_mosaic.version = 11 : i64} {
  func.func @_durator_mlp_kernel(%arg0: i32, %arg1: memref<16x32xf32, #tpu.memory_space<vmem>>, %arg2: memref<32x32xbf16, #tpu.memory_space<vmem>>, %arg3: memref<1x32xf32, #tpu.memory_space<vmem>>, %arg4: memref<32x128xbf16, #tpu.memory_space<vmem>>, %arg5: memref<1x128xf32, #tpu.memory_space<vmem>>, %arg6: memref<16x128xbf16, #tpu.memory_space<vmem>>) attributes {dimension_semantics = [#tpu.dimension_semantics<parallel>], iteration_bounds = array<i64: 1>, scalar_prefetch = 0 : i64, scratch_operands = 0 : i64, tpu.core_type = #tpu.core_type<tc>, window_params = [{transform_indices = @transform_0, window_bounds = array<i64: 16, 32>}, {pipeline_mode = #tpu.pipeline_mode<synchronous>, transform_indices = @transform_1, window_bounds = array<i64: 32, 32>}, {pipeline_mode = #tpu.pipeline_mode<synchronous>, transform_indices = @transform_2, window_bounds = array<i64: 1, 32>}, {pipeline_mode = #tpu.pipeline_mode<synchronous>, transform_indices = @transform_3, window_bounds = array<i64: 32, 128>}, {pipeline_mode = #tpu.pipeline_mode<synchronous>, transform_indices = @transform_4, window_bounds = array<i64: 1, 128>}, {transform_indices = @transform_5, window_bounds = array<i64: 16, 128>}]} {
    %c0 = arith.constant 0 : index
    %c0_0 = arith.constant 0 : index
    %0 = vector.load %arg1[%c0, %c0_0] : memref<16x32xf32, #tpu.memory_space<vmem>>, vector<16x32xf32>
    %1 = arith.truncf %0 : vector<16x32xf32> to vector<16x32xbf16>
    %c0_1 = arith.constant 0 : index
    %c0_2 = arith.constant 0 : index
    %2 = vector.load %arg2[%c0_1, %c0_2] : memref<32x32xbf16, #tpu.memory_space<vmem>>, vector<32x32xbf16>
    %cst = arith.constant dense<0.000000e+00> : vector<16x32xf32>
    %3 = tpu.matmul %1, %2, %cst {dimension_numbers = #tpu.dot_dimension_numbers<[1], [0], [0], [1], [0, 0, 1, 1], [], []>} : vector<16x32xbf16>, vector<32x32xbf16>, vector<16x32xf32> -> vector<16x32xf32>
    %c0_3 = arith.constant 0 : index
    %c0_4 = arith.constant 0 : index
    %4 = vector.load %arg3[%c0_3, %c0_4] : memref<1x32xf32, #tpu.memory_space<vmem>>, vector<1x32xf32>
    %5 = vector.broadcast %4 : vector<1x32xf32> to vector<16x32xf32>
    %6 = arith.addf %3, %5 : vector<16x32xf32>
    %cst_5 = arith.constant 0.000000e+00 : f32
    %7 = vector.broadcast %cst_5 : f32 to vector<16x32xf32>
    %8 = arith.subf %7, %6 : vector<16x32xf32>
    %9 = math.exp %8 : vector<16x32xf32>
    %cst_6 = arith.constant 1.000000e+00 : f32
    %10 = vector.broadcast %cst_6 : f32 to vector<16x32xf32>
    %11 = arith.addf %10, %9 : vector<16x32xf32>
    %12 = tpu.reciprocal %11 {approx = true} : vector<16x32xf32> -> vector<16x32xf32>
    %13 = arith.mulf %6, %12 : vector<16x32xf32>
    %14 = arith.truncf %13 : vector<16x32xf32> to vector<16x32xbf16>
    %c0_7 = arith.constant 0 : index
    %c0_8 = arith.constant 0 : index
    %15 = vector.load %arg4[%c0_7, %c0_8] : memref<32x128xbf16, #tpu.memory_space<vmem>>, vector<32x128xbf16>
    %cst_9 = arith.constant dense<0.000000e+00> : vector<16x128xf32>
    %16 = tpu.matmul %14, %15, %cst_9 {dimension_numbers = #tpu.dot_dimension_numbers<[1], [0], [0], [1], [0, 0, 1, 1], [], []>} : vector<16x32xbf16>, vector<32x128xbf16>, vector<16x128xf32> -> vector<16x128xf32>
    %c0_10 = arith.constant 0 : index
    %c0_11 = arith.constant 0 : index
    %17 = vector.load %arg5[%c0_10, %c0_11] : memref<1x128xf32, #tpu.memory_space<vmem>>, vector<1x128xf32>
    %18 = vector.broadcast %17 : vector<1x128xf32> to vector<16x128xf32>
    %19 = arith.addf %16, %18 : vector<16x128xf32>
    %cst_12 = arith.constant 0.000000e+00 : f32
    %20 = vector.broadcast %cst_12 : f32 to vector<16x128xf32>
    %21 = arith.subf %20, %19 : vector<16x128xf32>
    %22 = math.exp %21 : vector<16x128xf32>
    %cst_13 = arith.constant 1.000000e+00 : f32
    %23 = vector.broadcast %cst_13 : f32 to vector<16x128xf32>
    %24 = arith.addf %23, %22 : vector<16x128xf32>
    %25 = tpu.reciprocal %24 {approx = true} : vector<16x128xf32> -> vector<16x128xf32>
    %26 = arith.mulf %19, %25 : vector<16x128xf32>
    %27 = arith.truncf %26 : vector<16x128xf32> to vector<16x128xbf16>
    %c0_14 = arith.constant 0 : index
    %c0_15 = arith.constant 0 : index
    %28 = vector.load %arg6[%c0_14, %c0_15] : memref<16x128xbf16, #tpu.memory_space<vmem>>, vector<16x128xbf16>
    tpu.vector_store %arg6[%c0_14, %c0_15], %27 {strides = array<i32>} : memref<16x128xbf16, #tpu.memory_space<vmem>>, vector<16x128xbf16>,
    return
  }
  func.func @transform_0(%arg0: i32) -> (i32, i32) {
    %c0_i32 = arith.constant 0 : i32
    %c0_i32_0 = arith.constant 0 : i32
    return %arg0, %c0_i32 : i32, i32
  }
  func.func @transform_1(%arg0: i32) -> (i32, i32) {
    %c0_i32 = arith.constant 0 : i32
    %c0_i32_0 = arith.constant 0 : i32
    %c0_i32_1 = arith.constant 0 : i32
    return %c0_i32, %c0_i32_0 : i32, i32
  }
  func.func @transform_2(%arg0: i32) -> (i32, i32) {
    %c0_i32 = arith.constant 0 : i32
    %c0_i32_0 = arith.constant 0 : i32
    %c0_i32_1 = arith.constant 0 : i32
    return %c0_i32, %c0_i32_0 : i32, i32
  }
  func.func @transform_3(%arg0: i32) -> (i32, i32) {
    %c0_i32 = arith.constant 0 : i32
    %c0_i32_0 = arith.constant 0 : i32
    %c0_i32_1 = arith.constant 0 : i32
    return %c0_i32, %c0_i32_0 : i32, i32
  }
  func.func @transform_4(%arg0: i32) -> (i32, i32) {
    %c0_i32 = arith.constant 0 : i32
    %c0_i32_0 = arith.constant 0 : i32
    %c0_i32_1 = arith.constant 0 : i32
    return %c0_i32, %c0_i32_0 : i32, i32
  }
  func.func @transform_5(%arg0: i32) -> (i32, i32) {
    %c0_i32 = arith.constant 0 : i32
    %c0_i32_0 = arith.constant 0 : i32
    return %arg0, %c0_i32 : i32, i32
  }
}

module attributes {stable_mosaic.version = 11 : i64} {
  func.func @_durator_mlp_kernel(%arg0: i32, %arg1: memref<16x32xf32, #tpu.memory_space<vmem>>, %arg2: memref<32x32xbf16, #tpu.memory_space<vmem>>, %arg3: memref<1x32xf32, #tpu.memory_space<vmem>>, %arg4: memref<32x128xbf16, #tpu.memory_space<vmem>>, %arg5: memref<1x128xf32, #tpu.memory_space<vmem>>, %arg6: memref<16x128xbf16, #tpu.memory_space<vmem>>) attributes {dimension_semantics = [#tpu.dimension_semantics<parallel>], iteration_bounds = array<i64: 1>, scalar_prefetch = 0 : i64, scratch_operands = 0 : i64, tpu.core_type = #tpu.core_type<tc>, window_params = [{transform_indices = @transform_0, window_bounds = array<i64: 16, 32>}, {pipeline_mode = #tpu.pipeline_mode<synchronous>, transform_indices = @transform_1, window_bounds = array<i64: 32, 32>}, {pipeline_mode = #tpu.pipeline_mode<synchronous>, transform_indices = @transform_2, window_bounds = array<i64: 1, 32>}, {pipeline_mode = #tpu.pipeline_mode<synchronous>, transform_indices = @transform_3, window_bounds = array<i64: 32, 128>}, {pipeline_mode = #tpu.pipeline_mode<synchronous>, transform_indices = @transform_4, window_bounds = array<i64: 1, 128>}, {transform_indices = @transform_5, window_bounds = array<i64: 16, 128>}]} {
    %c0 = arith.constant 0 : index
    %c0_0 = arith.constant 0 : index
    %0 = vector.load %arg1[%c0, %c0_0] : memref<16x32xf32, #tpu.memory_space<vmem>>, vector<16x32xf32>
    %1 = arith.truncf %0 : vector<16x32xf32> to vector<16x32xbf16>
    %c0_1 = arith.constant 0 : index
    %c0_2 = arith.constant 0 : index
    %2 = vector.load %arg2[%c0_1, %c0_2] : memref<32x32xbf16, #tpu.memory_space<vmem>>, vector<32x32xbf16>
    %cst = arith.constant dense<0.000000e+00> : vector<16x32xf32>
    %3 = tpu.matmul %1, %2, %cst {dimension_numbers = #tpu.dot_dimension_numbers<[1], [0], [0], [1], [0, 0, 1, 1], [], []>} : vector<16x32xbf16>, vector<32x32xbf16>, vector<16x32xf32> -> vector<16x32xf32>
    %c0_3 = arith.constant 0 : index
    %c0_4 = arith.constant 0 : index
    %4 = vector.load %arg3[%c0_3, %c0_4] : memref<1x32xf32, #tpu.memory_space<vmem>>, vector<1x32xf32>
    %5 = vector.broadcast %4 : vector<1x32xf32> to vector<16x32xf32>
    %6 = arith.addf %3, %5 : vector<16x32xf32>
    %cst_5 = arith.constant 0.000000e+00 : f32
    %7 = vector.broadcast %cst_5 : f32 to vector<16x32xf32>
    %8 = arith.subf %7, %6 : vector<16x32xf32>
    %9 = math.exp %8 : vector<16x32xf32>
    %cst_6 = arith.constant 1.000000e+00 : f32
    %10 = vector.broadcast %cst_6 : f32 to vector<16x32xf32>
    %11 = arith.addf %10, %9 : vector<16x32xf32>
    %12 = tpu.reciprocal %11 {approx = true} : vector<16x32xf32> -> vector<16x32xf32>
    %13 = arith.mulf %6, %12 : vector<16x32xf32>
    %14 = arith.truncf %13 : vector<16x32xf32> to vector<16x32xbf16>
    %c0_7 = arith.constant 0 : index
    %c0_8 = arith.constant 0 : index
    %15 = vector.load %arg4[%c0_7, %c0_8] : memref<32x128xbf16, #tpu.memory_space<vmem>>, vector<32x128xbf16>
    %cst_9 = arith.constant dense<0.000000e+00> : vector<16x128xf32>
    %16 = tpu.matmul %14, %15, %cst_9 {dimension_numbers = #tpu.dot_dimension_numbers<[1], [0], [0], [1], [0, 0, 1, 1], [], []>} : vector<16x32xbf16>, vector<32x128xbf16>, vector<16x128xf32> -> vector<16x128xf32>
    %c0_10 = arith.constant 0 : index
    %c0_11 = arith.constant 0 : index
    %17 = vector.load %arg5[%c0_10, %c0_11] : memref<1x128xf32, #tpu.memory_space<vmem>>, vector<1x128xf32>
    %18 = vector.broadcast %17 : vector<1x128xf32> to vector<16x128xf32>
    %19 = arith.addf %16, %18 : vector<16x128xf32>
    %cst_12 = arith.constant 0.000000e+00 : f32
    %20 = vector.broadcast %cst_12 : f32 to vector<16x128xf32>
    %21 = arith.subf %20, %19 : vector<16x128xf32>
    %22 = math.exp %21 : vector<16x128xf32>
    %cst_13 = arith.constant 1.000000e+00 : f32
    %23 = vector.broadcast %cst_13 : f32 to vector<16x128xf32>
    %24 = arith.addf %23, %22 : vector<16x128xf32>
    %25 = tpu.reciprocal %24 {approx = true} : vector<16x128xf32> -> vector<16x128xf32>
    %26 = arith.mulf %19, %25 : vector<16x128xf32>
    %27 = arith.truncf %26 : vector<16x128xf32> to vector<16x128xbf16>
    %c0_14 = arith.constant 0 : index
    %c0_15 = arith.constant 0 : index
    %28 = vector.load %arg6[%c0_14, %c0_15] : memref<16x128xbf16, #tpu.memory_space<vmem>>, vector<16x128xbf16>
    tpu.vector_store %arg6[%c0_14, %c0_15], %27 {strides = array<i32>} : memref<16x128xbf16, #tpu.memory_space<vmem>>, vector<16x128xbf16>,
    return
  }
  func.func @transform_0(%arg0: i32) -> (i32, i32) {
    %c0_i32 = arith.constant 0 : i32
    %c0_i32_0 = arith.constant 0 : i32
    return %arg0, %c0_i32 : i32, i32
  }
  func.func @transform_1(%arg0: i32) -> (i32, i32) {
    %c0_i32 = arith.constant 0 : i32
    %c0_i32_0 = arith.constant 0 : i32
    %c0_i32_1 = arith.constant 0 : i32
    return %c0_i32, %c0_i32_0 : i32, i32
  }
  func.func @transform_2(%arg0: i32) -> (i32, i32) {
    %c0_i32 = arith.constant 0 : i32
    %c0_i32_0 = arith.constant 0 : i32
    %c0_i32_1 = arith.constant 0 : i32
    return %c0_i32, %c0_i32_0 : i32, i32
  }
  func.func @transform_3(%arg0: i32) -> (i32, i32) {
    %c0_i32 = arith.constant 0 : i32
    %c0_i32_0 = arith.constant 0 : i32
    %c0_i32_1 = arith.constant 0 : i32
    return %c0_i32, %c0_i32_0 : i32, i32
  }
  func.func @transform_4(%arg0: i32) -> (i32, i32) {
    %c0_i32 = arith.constant 0 : i32
    %c0_i32_0 = arith.constant 0 : i32
    %c0_i32_1 = arith.constant 0 : i32
    return %c0_i32, %c0_i32_0 : i32, i32
  }
  func.func @transform_5(%arg0: i32) -> (i32, i32) {
    %c0_i32 = arith.constant 0 : i32
    %c0_i32_0 = arith.constant 0 : i32
    return %arg0, %c0_i32 : i32, i32
  }
}

</mosaic_0001>

<bundles_post_ra>
// kernel: tpu_custom_call.1
= control target key start
LH: loop header
LB: loop body
LE: loop exit
PB: predicated region body
PF: predicated region fallthrough
CT: control target
= control target key end

     0   :  { %10 = vsyncpa [#allocation3], 0  ;;  %s522_s0 = inlined_call_operand.hbm [shape: f32[16,32], index: 0, kind: input, shape index: {}]   ;;  %s523_s1 = inlined_call_operand.hbm [shape: bf16[32,32], index: 1, kind: input, shape index: {}]   ;;  %s524_s2 = inlined_call_operand.vmem [shape: f32[1,32], index: 2, kind: input, shape index: {}]   ;;  %s525_s3 = inlined_call_operand.hbm [shape: bf16[32,128], index: 3, kind: input, shape index: {}]   ;;  %s526_s4 = inlined_call_operand.vmem [shape: f32[1,128], index: 4, kind: input, shape index: {}]   ;;  %s527_s5 = inlined_call_operand.hbm [shape: bf16[16,128], index: 5, kind: output, shape index: {}]  }
   0x1   :  { %11 = vsyncpa [#allocation6], 0 }
   0x2   :  { %12 = vsyncpa [#allocation4], 0  ;;  %s417_s18 = smov [#allocation5]   ;;  %s323_s22 = scalar_lea.hbm %s523_s1, 256 }
   0x3   :  { %s30_s19 = sshll.u32 %s417_s18, 4  ;;  %p324_p0 = scmp.ne.s32.totalorder %s523_s1, %s323_s22  ;;  %s31_s19 = int_to_ptr.vmem [resolvable:$true] %s30_s19 }
   0x4   :  { %p327_p1 = scmp.lt.u32.totalorder %s323_s22, %s523_s1 }
   0x6   :  { %p329_p2 = pnand %p327_p1, %p324_p0 }
   0x8   :  { %332 = shalt.err (!%p329_p2)
}
   0x9   :  { %s333_s27 = scalar_lea.vmem %s31_s19, 256  ;;  %p338_p4 = scmp.lt.s32.totalorder %s31_s19, %s31_s19 }
   0xa   :  { %p334_p3 = scmp.ne.s32.totalorder %s31_s19, %s333_s27  ;;  %p339_p5 = scmp.lt.s32.totalorder %s333_s27, %s333_s27 }
   0xc   :  { %p340_p6 = por %p339_p5, %p338_p4 }
   0xe   :  { %p341_p7 = pnand %p340_p6, %p334_p3 }
  0x10   :  { %344 = shalt.err (!%p341_p7)
}
  0x11   :  { %s418_s28 = smov 64   ;;  %s419_s29 = smov 4  }
  0x12   :  { %36 = dma.hbm_to_vmem [thread:$0]  %s523_s1, 256, %s31_s19, [#allocation6], %s418_s28, %s418_s28, %s419_s29  }
  0x13   :  { %s420_s7 = smov [#allocation2]   ;;  %s345_s11 = scalar_lea.hbm %s522_s0, 256 }
  0x14   :  { %s18_s8 = sshll.u32 %s420_s7, 4  ;;  %p346_p8 = scmp.ne.s32.totalorder %s522_s0, %s345_s11  ;;  %s19_s8 = int_to_ptr.vmem [resolvable:$true] %s18_s8 }
  0x15   :  { %p349_p9 = scmp.lt.u32.totalorder %s345_s11, %s522_s0 }
  0x17   :  { %p351_p10 = pnand %p349_p9, %p346_p8 }
  0x19   :  { %354 = shalt.err (!%p351_p10)
}
  0x1a   :  { %s355_s16 = scalar_lea.vmem %s19_s8, 256  ;;  %p360_p12 = scmp.lt.s32.totalorder %s19_s8, %s19_s8 }
  0x1b   :  { %p356_p11 = scmp.ne.s32.totalorder %s19_s8, %s355_s16  ;;  %p361_p13 = scmp.lt.s32.totalorder %s355_s16, %s355_s16 }
  0x1d   :  { %p362_p0 = por %p361_p13, %p360_p12 }
  0x1f   :  { %p363_p1 = pnand %p362_p0, %p356_p11 }
  0x21   :  { %366 = shalt.err (!%p363_p1)
}
  0x22   :  { %s421_s1 = smov 128   ;;  %s422_s17 = smov 8  }
  0x23   :  { %24 = dma.hbm_to_vmem [thread:$0]  %s522_s0, 256, %s19_s8, [#allocation3], %s421_s1, %s421_s1, %s422_s17  }
  0x24   :  { %s423_s20 = smov [#allocation7]   ;;  %s367_s24 = scalar_lea.hbm %s525_s3, 256 }
  0x25   :  { %s44_s21 = sshll.u32 %s423_s20, 4  ;;  %p368_p2 = scmp.ne.s32.totalorder %s525_s3, %s367_s24  ;;  %s45_s21 = int_to_ptr.vmem [resolvable:$true] %s44_s21 }
  0x26   :  { %p371_p3 = scmp.lt.u32.totalorder %s367_s24, %s525_s3 }
  0x28   :  { %p373_p4 = pnand %p371_p3, %p368_p2 }
  0x2a   :  { %376 = shalt.err (!%p373_p4)
}
  0x2b   :  { %s377_s6 = scalar_lea.vmem %s45_s21, 256  ;;  %p382_p6 = scmp.lt.s32.totalorder %s45_s21, %s45_s21 }
  0x2c   :  { %p378_p5 = scmp.ne.s32.totalorder %s45_s21, %s377_s6  ;;  %p383_p7 = scmp.lt.s32.totalorder %s377_s6, %s377_s6 }
  0x2e   :  { %p384_p8 = por %p383_p7, %p382_p6 }
  0x30   :  { %p385_p9 = pnand %p384_p8, %p378_p5 }
  0x32   :  { %388 = shalt.err (!%p385_p9)
}
  0x33   :  { %50 = dma.hbm_to_vmem [thread:$0]  %s525_s3, 256, %s45_s21, [#allocation6], %s418_s28, %s418_s28, %s419_s29  }
  0x34   :  { %411 = dma.done.wait [#allocation3], 256  }
  0x35   :  { %412 = vsyncadd [#allocation3], 4294967040 }
  0x36   :  { %413 = dma.done.wait [#allocation6], 512  }
  0x37   :  { %414 = vsyncadd [#allocation6], 4294966784  ;;  %v424_v0 = vmov 0.0   ;;  %vm425_vm0 = vmmov 0   ;;  %v303_v1 = vld [vmem:[#allocation5] sm:$0xff]   ;;  %v304_v2 = vld [vmem:[#allocation5 + $0x8] sm:$0xff]  }
  0x38   :  { %277 = vmatprep.subr.bf16.mxu0 %v424_v0  ;;  %281 = vmatprep.mubr.msk.bf16.mxu0 %vm425_vm0, %v424_v0  ;;  %v63_v3 = vld [vmem:[#allocation2] sm:$0xff]  ;;  %v64_v4 = vld [vmem:[#allocation2 + $0x8] sm:$0xff]  ;;  %vm89_vm1 = vcmask 261120  }
  0x39   :  { %285 = vmatprep.subr.bf16.mxu1 %v424_v0  ;;  %289 = vmatprep.mubr.msk.bf16.mxu1 %vm425_vm0, %v424_v0  ;;  %v65_v5 = vpack.c.bf16 %v64_v4, %v63_v3  ;;  %v305_v6 = vld [vmem:[#allocation7] sm:$0xff]   ;;  %v306_v7 = vld [vmem:[#allocation7 + $0x8] sm:$0xff]  }
  0x3a   :  { %278 = vmatpush3.bf16.msra.mxu0 %v303_v1  ;;  %286 = vmatpush3.bf16.msra.mxu1 %v305_v6  ;;  %v254_v8 = vld [vmem:[%s524_s2] ss:$0 sm:$0xff] }
  0x3b   :  { %279 = vmatprep.subr.bf16.mxu0 %v424_v0  ;;  %287 = vmatprep.subr.bf16.mxu1 %v424_v0  ;;  %v258_v28 = vld [vmem:[%s526_s4] ss:$0 sm:$0xff]  ;;  %s426_s4 = smov [#allocation8]  }
  0x3c   :  { %s241_s10 = sshll.u32 %s426_s4, 4  ;;  %s242_s10 = int_to_ptr.vmem [resolvable:$true] %s241_s10 }
  0x3d   :  { %s389_s11 = scalar_lea.vmem %s242_s10, 128  ;;  %p394_p11 = scmp.lt.s32.totalorder %s242_s10, %s242_s10 }
  0x3e   :  { %280 = vmatpush3.bf16.msra.mxu0 %v304_v2  ;;  %288 = vmatpush3.bf16.msra.mxu1 %v306_v7  ;;  %p390_p10 = scmp.ne.s32.totalorder %s242_s10, %s389_s11  ;;  %p395_p12 = scmp.lt.s32.totalorder %s389_s11, %s389_s11 }
  0x40   :  { %p396_p13 = por %p395_p12, %p394_p11 }
  0x41   :  { %282 = vmatmul.mubr.msk.bf16.vlgmr.msra.gmra.mrb[0].mxu0 %vm89_vm1, %v65_v5 }
  0x42   :  { %p397_p0 = pnand %p396_p13, %p390_p10 }
 0x114   :  { %v127_v9 = vpop.f32.mrb[0].mxu0 }
 0x115   :  { %v128_v10 = vadd.f32 %v254_v8, %v127_v9  ;;  %v283_v11 = vpop.f32.mrb[1].mxu0 }
 0x116   :  { %v130_v12 = vpop.f32.mrb[2].mxu0 }
 0x117   :  { %v134_v13 = vsub.f32 0.0, %v128_v10  ;;  %v131_v14 = vadd.f32 %v254_v8, %v130_v12  ;;  %v284_v15 = vpop.f32.mrb[3].mxu0 }
 0x119   :  { %v136_v16 = vmul.f32 1.442695, %v134_v13  ;;  %v135_v17 = vsub.f32 0.0, %v131_v14 }
 0x11b   :  { %307 = vpow2.f32 %v136_v16  ;;  %v138_v18 = vmul.f32 1.442695, %v135_v17 }
 0x11d   :  { %309 = vpow2.f32 %v138_v18 }
 0x125   :  { %v308_v19 = vpop.eup %307 }
 0x126   :  { %v140_v20 = vadd.f32 1.0, %v308_v19 }
 0x127   :  { %v310_v21 = vpop.eup %309 }
 0x128   :  { %311 = vrcp.f32 %v140_v20  ;;  %v141_v22 = vadd.f32 1.0, %v310_v21 }
 0x12a   :  { %313 = vrcp.f32 %v141_v22 }
 0x132   :  { %v312_v23 = vpop.eup %311 }
 0x133   :  { %v144_v25 = vmul.f32 %v312_v23, %v128_v10 }
 0x134   :  { %v314_v24 = vpop.eup %313 }
 0x135   :  { %v145_v26 = vmul.f32 %v314_v24, %v131_v14 }
 0x137   :  { %v146_v27 = vpack.c.bf16 %v145_v26, %v144_v25 }
 0x139   :  { %290 = vmatmul.mubr.msk.bf16.vlgmr.msra.gmra.mrb[0].mxu1 %vm89_vm1, %v146_v27 }
 0x20c   :  { %v207_v29 = vpop.f32.mrb[0].mxu1 }
 0x20d   :  { %v208_v30 = vadd.f32 %v258_v28, %v207_v29  ;;  %v291_v31 = vpop.f32.mrb[1].mxu1 }
 0x20e   :  { %v210_v32 = vpop.f32.mrb[2].mxu1 }
 0x20f   :  { %v214_v33 = vsub.f32 0.0, %v208_v30  ;;  %v211_v34 = vadd.f32 %v258_v28, %v210_v32  ;;  %v292_v35 = vpop.f32.mrb[3].mxu1 }
 0x211   :  { %v216_v36 = vmul.f32 1.442695, %v214_v33  ;;  %v215_v37 = vsub.f32 0.0, %v211_v34 }
 0x213   :  { %315 = vpow2.f32 %v216_v36  ;;  %v218_v38 = vmul.f32 1.442695, %v215_v37 }
 0x215   :  { %317 = vpow2.f32 %v218_v38 }
 0x21d   :  { %v316_v39 = vpop.eup %315 }
 0x21e   :  { %v220_v40 = vadd.f32 1.0, %v316_v39 }
 0x21f   :  { %v318_v41 = vpop.eup %317 }
 0x220   :  { %319 = vrcp.f32 %v220_v40  ;;  %v221_v42 = vadd.f32 1.0, %v318_v41 }
 0x222   :  { %321 = vrcp.f32 %v221_v42 }
 0x22a   :  { %v320_v43 = vpop.eup %319 }
 0x22b   :  { %v224_v45 = vmul.f32 %v320_v43, %v208_v30 }
 0x22c   :  { %v322_v44 = vpop.eup %321 }
 0x22d   :  { %v225_v46 = vmul.f32 %v322_v44, %v211_v34 }
 0x22f   :  { %v269_v47 = vpack.c.bf16 %v225_v46, %v224_v45 }
 0x231   :  { %270 = vst [vmem:[#allocation8] sm:$0xff] %v269_v47  }
 0x232   :  { %400 = shalt.err (!%p397_p0)
}
 0x233   :  { %s401_s14 = scalar_lea.hbm %s527_s5, 128 }
 0x234   :  { %p402_p1 = scmp.ne.s32.totalorder %s527_s5, %s401_s14  ;;  %p405_p2 = scmp.lt.u32.totalorder %s401_s14, %s527_s5 }
 0x236   :  { %p407_p3 = pnand %p405_p2, %p402_p1 }
 0x238   :  { %410 = shalt.err (!%p407_p3)
}
 0x239   :  { %247 = dma.vmem_to_hbm [thread:$0]  %s242_s10, 128, %s527_s5, [#allocation4], %s418_s28, %s418_s28, %s419_s29  }
 0x23a   :  { %415 = dma.done.wait [#allocation4], 128  }
 0x23b   :  { %416 = vsyncadd [#allocation4], 4294967168 }
 0x23c   :  { %251 = vsyncpa [#allocation3], 1 }
 0x23d   :  { %252 = vsyncpa [#allocation6], 1 }
 0x23e   :  { %253 = vsyncpa [#allocation4], 1 }

// kernel: tpu_custom_call.1
= control target key start
LH: loop header
LB: loop body
LE: loop exit
PB: predicated region body
PF: predicated region fallthrough
CT: control target
= control target key end

     0   :  { %10 = vsyncpa [#allocation3], 0  ;;  %s522_s0 = inlined_call_operand.hbm [shape: f32[16,32], index: 0, kind: input, shape index: {}]   ;;  %s523_s1 = inlined_call_operand.hbm [shape: bf16[32,32], index: 1, kind: input, shape index: {}]   ;;  %s524_s2 = inlined_call_operand.vmem [shape: f32[1,32], index: 2, kind: input, shape index: {}]   ;;  %s525_s3 = inlined_call_operand.hbm [shape: bf16[32,128], index: 3, kind: input, shape index: {}]   ;;  %s526_s4 = inlined_call_operand.vmem [shape: f32[1,128], index: 4, kind: input, shape index: {}]   ;;  %s527_s5 = inlined_call_operand.hbm [shape: bf16[16,128], index: 5, kind: output, shape index: {}]  }
   0x1   :  { %11 = vsyncpa [#allocation6], 0 }
   0x2   :  { %12 = vsyncpa [#allocation4], 0  ;;  %s417_s18 = smov [#allocation5]   ;;  %s323_s22 = scalar_lea.hbm %s523_s1, 256 }
   0x3   :  { %s30_s19 = sshll.u32 %s417_s18, 4  ;;  %p324_p0 = scmp.ne.s32.totalorder %s523_s1, %s323_s22  ;;  %s31_s19 = int_to_ptr.vmem [resolvable:$true] %s30_s19 }
   0x4   :  { %p327_p1 = scmp.lt.u32.totalorder %s323_s22, %s523_s1 }
   0x6   :  { %p329_p2 = pnand %p327_p1, %p324_p0 }
   0x8   :  { %332 = shalt.err (!%p329_p2)
}
   0x9   :  { %s333_s27 = scalar_lea.vmem %s31_s19, 256  ;;  %p338_p4 = scmp.lt.s32.totalorder %s31_s19, %s31_s19 }
   0xa   :  { %p334_p3 = scmp.ne.s32.totalorder %s31_s19, %s333_s27  ;;  %p339_p5 = scmp.lt.s32.totalorder %s333_s27, %s333_s27 }
   0xc   :  { %p340_p6 = por %p339_p5, %p338_p4 }
   0xe   :  { %p341_p7 = pnand %p340_p6, %p334_p3 }
  0x10   :  { %344 = shalt.err (!%p341_p7)
}
  0x11   :  { %s418_s28 = smov 64   ;;  %s419_s29 = smov 4  }
  0x12   :  { %36 = dma.hbm_to_vmem [thread:$0]  %s523_s1, 256, %s31_s19, [#allocation6], %s418_s28, %s418_s28, %s419_s29  }
  0x13   :  { %s420_s7 = smov [#allocation2]   ;;  %s345_s11 = scalar_lea.hbm %s522_s0, 256 }
  0x14   :  { %s18_s8 = sshll.u32 %s420_s7, 4  ;;  %p346_p8 = scmp.ne.s32.totalorder %s522_s0, %s345_s11  ;;  %s19_s8 = int_to_ptr.vmem [resolvable:$true] %s18_s8 }
  0x15   :  { %p349_p9 = scmp.lt.u32.totalorder %s345_s11, %s522_s0 }
  0x17   :  { %p351_p10 = pnand %p349_p9, %p346_p8 }
  0x19   :  { %354 = shalt.err (!%p351_p10)
}
  0x1a   :  { %s355_s16 = scalar_lea.vmem %s19_s8, 256  ;;  %p360_p12 = scmp.lt.s32.totalorder %s19_s8, %s19_s8 }
  0x1b   :  { %p356_p11 = scmp.ne.s32.totalorder %s19_s8, %s355_s16  ;;  %p361_p13 = scmp.lt.s32.totalorder %s355_s16, %s355_s16 }
  0x1d   :  { %p362_p0 = por %p361_p13, %p360_p12 }
  0x1f   :  { %p363_p1 = pnand %p362_p0, %p356_p11 }
  0x21   :  { %366 = shalt.err (!%p363_p1)
}
  0x22   :  { %s421_s1 = smov 128   ;;  %s422_s17 = smov 8  }
  0x23   :  { %24 = dma.hbm_to_vmem [thread:$0]  %s522_s0, 256, %s19_s8, [#allocation3], %s421_s1, %s421_s1, %s422_s17  }
  0x24   :  { %s423_s20 = smov [#allocation7]   ;;  %s367_s24 = scalar_lea.hbm %s525_s3, 256 }
  0x25   :  { %s44_s21 = sshll.u32 %s423_s20, 4  ;;  %p368_p2 = scmp.ne.s32.totalorder %s525_s3, %s367_s24  ;;  %s45_s21 = int_to_ptr.vmem [resolvable:$true] %s44_s21 }
  0x26   :  { %p371_p3 = scmp.lt.u32.totalorder %s367_s24, %s525_s3 }
  0x28   :  { %p373_p4 = pnand %p371_p3, %p368_p2 }
  0x2a   :  { %376 = shalt.err (!%p373_p4)
}
  0x2b   :  { %s377_s6 = scalar_lea.vmem %s45_s21, 256  ;;  %p382_p6 = scmp.lt.s32.totalorder %s45_s21, %s45_s21 }
  0x2c   :  { %p378_p5 = scmp.ne.s32.totalorder %s45_s21, %s377_s6  ;;  %p383_p7 = scmp.lt.s32.totalorder %s377_s6, %s377_s6 }
  0x2e   :  { %p384_p8 = por %p383_p7, %p382_p6 }
  0x30   :  { %p385_p9 = pnand %p384_p8, %p378_p5 }
  0x32   :  { %388 = shalt.err (!%p385_p9)
}
  0x33   :  { %50 = dma.hbm_to_vmem [thread:$0]  %s525_s3, 256, %s45_s21, [#allocation6], %s418_s28, %s418_s28, %s419_s29  }
  0x34   :  { %411 = dma.done.wait [#allocation3], 256  }
  0x35   :  { %412 = vsyncadd [#allocation3], 4294967040 }
  0x36   :  { %413 = dma.done.wait [#allocation6], 512  }
  0x37   :  { %414 = vsyncadd [#allocation6], 4294966784  ;;  %v424_v0 = vmov 0.0   ;;  %vm425_vm0 = vmmov 0   ;;  %v303_v1 = vld [vmem:[#allocation5] sm:$0xff]   ;;  %v304_v2 = vld [vmem:[#allocation5 + $0x8] sm:$0xff]  }
  0x38   :  { %277 = vmatprep.subr.bf16.mxu0 %v424_v0  ;;  %281 = vmatprep.mubr.msk.bf16.mxu0 %vm425_vm0, %v424_v0  ;;  %v63_v3 = vld [vmem:[#allocation2] sm:$0xff]  ;;  %v64_v4 = vld [vmem:[#allocation2 + $0x8] sm:$0xff]  ;;  %vm89_vm1 = vcmask 261120  }
  0x39   :  { %285 = vmatprep.subr.bf16.mxu1 %v424_v0  ;;  %289 = vmatprep.mubr.msk.bf16.mxu1 %vm425_vm0, %v424_v0  ;;  %v65_v5 = vpack.c.bf16 %v64_v4, %v63_v3  ;;  %v305_v6 = vld [vmem:[#allocation7] sm:$0xff]   ;;  %v306_v7 = vld [vmem:[#allocation7 + $0x8] sm:$0xff]  }
  0x3a   :  { %278 = vmatpush3.bf16.msra.mxu0 %v303_v1  ;;  %286 = vmatpush3.bf16.msra.mxu1 %v305_v6  ;;  %v254_v8 = vld [vmem:[%s524_s2] ss:$0 sm:$0xff] }
  0x3b   :  { %279 = vmatprep.subr.bf16.mxu0 %v424_v0  ;;  %287 = vmatprep.subr.bf16.mxu1 %v424_v0  ;;  %v258_v28 = vld [vmem:[%s526_s4] ss:$0 sm:$0xff]  ;;  %s426_s4 = smov [#allocation8]  }
  0x3c   :  { %s241_s10 = sshll.u32 %s426_s4, 4  ;;  %s242_s10 = int_to_ptr.vmem [resolvable:$true] %s241_s10 }
  0x3d   :  { %s389_s11 = scalar_lea.vmem %s242_s10, 128  ;;  %p394_p11 = scmp.lt.s32.totalorder %s242_s10, %s242_s10 }
  0x3e   :  { %280 = vmatpush3.bf16.msra.mxu0 %v304_v2  ;;  %288 = vmatpush3.bf16.msra.mxu1 %v306_v7  ;;  %p390_p10 = scmp.ne.s32.totalorder %s242_s10, %s389_s11  ;;  %p395_p12 = scmp.lt.s32.totalorder %s389_s11, %s389_s11 }
  0x40   :  { %p396_p13 = por %p395_p12, %p394_p11 }
  0x41   :  { %282 = vmatmul.mubr.msk.bf16.vlgmr.msra.gmra.mrb[0].mxu0 %vm89_vm1, %v65_v5 }
  0x42   :  { %p397_p0 = pnand %p396_p13, %p390_p10 }
 0x114   :  { %v127_v9 = vpop.f32.mrb[0].mxu0 }
 0x115   :  { %v128_v10 = vadd.f32 %v254_v8, %v127_v9  ;;  %v283_v11 = vpop.f32.mrb[1].mxu0 }
 0x116   :  { %v130_v12 = vpop.f32.mrb[2].mxu0 }
 0x117   :  { %v134_v13 = vsub.f32 0.0, %v128_v10  ;;  %v131_v14 = vadd.f32 %v254_v8, %v130_v12  ;;  %v284_v15 = vpop.f32.mrb[3].mxu0 }
 0x119   :  { %v136_v16 = vmul.f32 1.442695, %v134_v13  ;;  %v135_v17 = vsub.f32 0.0, %v131_v14 }
 0x11b   :  { %307 = vpow2.f32 %v136_v16  ;;  %v138_v18 = vmul.f32 1.442695, %v135_v17 }
 0x11d   :  { %309 = vpow2.f32 %v138_v18 }
 0x125   :  { %v308_v19 = vpop.eup %307 }
 0x126   :  { %v140_v20 = vadd.f32 1.0, %v308_v19 }
 0x127   :  { %v310_v21 = vpop.eup %309 }
 0x128   :  { %311 = vrcp.f32 %v140_v20  ;;  %v141_v22 = vadd.f32 1.0, %v310_v21 }
 0x12a   :  { %313 = vrcp.f32 %v141_v22 }
 0x132   :  { %v312_v23 = vpop.eup %311 }
 0x133   :  { %v144_v25 = vmul.f32 %v312_v23, %v128_v10 }
 0x134   :  { %v314_v24 = vpop.eup %313 }
 0x135   :  { %v145_v26 = vmul.f32 %v314_v24, %v131_v14 }
 0x137   :  { %v146_v27 = vpack.c.bf16 %v145_v26, %v144_v25 }
 0x139   :  { %290 = vmatmul.mubr.msk.bf16.vlgmr.msra.gmra.mrb[0].mxu1 %vm89_vm1, %v146_v27 }
 0x20c   :  { %v207_v29 = vpop.f32.mrb[0].mxu1 }
 0x20d   :  { %v208_v30 = vadd.f32 %v258_v28, %v207_v29  ;;  %v291_v31 = vpop.f32.mrb[1].mxu1 }
 0x20e   :  { %v210_v32 = vpop.f32.mrb[2].mxu1 }
 0x20f   :  { %v214_v33 = vsub.f32 0.0, %v208_v30  ;;  %v211_v34 = vadd.f32 %v258_v28, %v210_v32  ;;  %v292_v35 = vpop.f32.mrb[3].mxu1 }
 0x211   :  { %v216_v36 = vmul.f32 1.442695, %v214_v33  ;;  %v215_v37 = vsub.f32 0.0, %v211_v34 }
 0x213   :  { %315 = vpow2.f32 %v216_v36  ;;  %v218_v38 = vmul.f32 1.442695, %v215_v37 }
 0x215   :  { %317 = vpow2.f32 %v218_v38 }
 0x21d   :  { %v316_v39 = vpop.eup %315 }
 0x21e   :  { %v220_v40 = vadd.f32 1.0, %v316_v39 }
 0x21f   :  { %v318_v41 = vpop.eup %317 }
 0x220   :  { %319 = vrcp.f32 %v220_v40  ;;  %v221_v42 = vadd.f32 1.0, %v318_v41 }
 0x222   :  { %321 = vrcp.f32 %v221_v42 }
 0x22a   :  { %v320_v43 = vpop.eup %319 }
 0x22b   :  { %v224_v45 = vmul.f32 %v320_v43, %v208_v30 }
 0x22c   :  { %v322_v44 = vpop.eup %321 }
 0x22d   :  { %v225_v46 = vmul.f32 %v322_v44, %v211_v34 }
 0x22f   :  { %v269_v47 = vpack.c.bf16 %v225_v46, %v224_v45 }
 0x231   :  { %270 = vst [vmem:[#allocation8] sm:$0xff] %v269_v47  }
 0x232   :  { %400 = shalt.err (!%p397_p0)
}
 0x233   :  { %s401_s14 = scalar_lea.hbm %s527_s5, 128 }
 0x234   :  { %p402_p1 = scmp.ne.s32.totalorder %s527_s5, %s401_s14  ;;  %p405_p2 = scmp.lt.u32.totalorder %s401_s14, %s527_s5 }
 0x236   :  { %p407_p3 = pnand %p405_p2, %p402_p1 }
 0x238   :  { %410 = shalt.err (!%p407_p3)
}
 0x239   :  { %247 = dma.vmem_to_hbm [thread:$0]  %s242_s10, 128, %s527_s5, [#allocation4], %s418_s28, %s418_s28, %s419_s29  }
 0x23a   :  { %415 = dma.done.wait [#allocation4], 128  }
 0x23b   :  { %416 = vsyncadd [#allocation4], 4294967168 }
 0x23c   :  { %251 = vsyncpa [#allocation3], 1 }
 0x23d   :  { %252 = vsyncpa [#allocation6], 1 }
 0x23e   :  { %253 = vsyncpa [#allocation4], 1 }

</bundles_post_ra>
